<compile_context>
chip_gen: v5e
topology: v5e:2x2
jax: 0.10.0
libtpu: 0.0.40
codegen_flags: <defaults>
</compile_context>

<pallas_src>
import jax
import jax.numpy as jnp
from jax.experimental import pallas as pl
from jax.experimental.pallas import tpu as pltpu


def _affine_coupling_kernel(z1_ref, z2_ref, ws_ref, bs_ref, wc_ref, bc_ref,
                            z2o_ref, ld_ref):
    # Grid = (batch, token_tile); token axis is the log-det reduction axis.
    t = pl.program_id(1)

    z1 = z1_ref[0]                      # (C1, TM)  lane-dense along HW
    # param_map (1x1 conv) as two tiny channel matmuls; HW stays on lanes.
    # NOTE: K=C1 is tiny for the MXU, but this kernel is HBM-bandwidth bound.
    shift = jnp.dot(ws_ref[...], z1, preferred_element_type=jnp.float32) + bs_ref[...]
    scale = jnp.dot(wc_ref[...], z1, preferred_element_type=jnp.float32) + bc_ref[...]

    # z2_new = z2 * exp(scale) + shift   (VPU + EUP, lane-dense stores)
    z2o_ref[0] = z2_ref[0] * jnp.exp(scale) + shift

    # Per-batch log|det| accumulator: output block index depends only on the
    # batch axis, so it stays VMEM-resident across the token axis.
    @pl.when(t == 0)
    def _init():
        ld_ref[...] = jnp.zeros_like(ld_ref)

    ld_ref[...] += jnp.sum(scale)       # scalar reduce (XLU) broadcast-added


def _pick_tile_hw(hw):
    # Largest lane-dense tile that divides HW; big tiles keep the DMA pipeline
    # near the HBM roofline while the per-step working set stays tiny
    # (2 bufs * TM * (C1 + 2*C2) * 4 B << v7x's 64 MiB VMEM).
    for tm in (2048, 1024, 512, 256, 128):
        if hw % tm == 0:
            return tm
    return hw  # full row: legal because block dim == full array dim


def affine_coupling_forward(z, w, b, *, tile_hw=None):
    """Forward pass of one AffineCoupling flow with a 1x1-conv param_map.

    z = [z1, z2], both NCHW float32.
    w: (2*C2, C1) 1x1-conv weight (PyTorch layout, kernel dims squeezed).
    b: (2*C2,)   1x1-conv bias.
    Returns ([z1, z2_new], log_det) with log_det shape (B,).
    """
    z1, z2 = z
    B, C1, H, W = z1.shape
    B2, C2, H2, W2 = z2.shape
    assert (B2, H2, W2) == (B, H, W)
    assert w.shape == (2 * C2, C1) and b.shape == (2 * C2,)
    HW = H * W
    TM = tile_hw if tile_hw is not None else _pick_tile_hw(HW)
    assert HW % TM == 0, "token tile must evenly divide H*W (log-det accumulator)"
    assert TM % 128 == 0 or TM == HW, "token tile must be lane-aligned or full"

    # Free reshapes only (no transposes): NCHW -> (B, C, HW).
    z1r = z1.reshape(B, C1, HW)
    z2r = z2.reshape(B, C2, HW)
    # torch: shift = param[:, 0::2], scale = param[:, 1::2]
    w_shift = w[0::2, :]
    w_scale = w[1::2, :]
    b_shift = b[0::2].reshape(C2, 1)
    b_scale = b[1::2].reshape(C2, 1)

    grid = (B, HW // TM)
    z2of, ld = pl.pallas_call(
        _affine_coupling_kernel,
        grid=grid,
        in_specs=[
            pl.BlockSpec((1, C1, TM), lambda bi, ti: (bi, 0, ti)),
            pl.BlockSpec((1, C2, TM), lambda bi, ti: (bi, 0, ti)),
            pl.BlockSpec((C2, C1), lambda bi, ti: (0, 0)),
            pl.BlockSpec((C2, 1), lambda bi, ti: (0, 0)),
            pl.BlockSpec((C2, C1), lambda bi, ti: (0, 0)),
            pl.BlockSpec((C2, 1), lambda bi, ti: (0, 0)),
        ],
        out_specs=[
            pl.BlockSpec((1, C2, TM), lambda bi, ti: (bi, 0, ti)),
            # per-batch log-det accumulator block, resident across token tiles
            pl.BlockSpec((1, 1, 128), lambda bi, ti: (bi, 0, 0)),
        ],
        out_shape=[
            jax.ShapeDtypeStruct((B, C2, HW), jnp.float32),
            jax.ShapeDtypeStruct((B, 1, 128), jnp.float32),
        ],
        # Reuse the z2 input buffer for z2_out (same shape/dtype/blocking).
        input_output_aliases={1: 0},
        compiler_params=pltpu.CompilerParams(
            dimension_semantics=("parallel", "arbitrary"),
            vmem_limit_bytes=32 * 1024 * 1024,  # modest; sized for v7x 64 MiB VMEM
        ),
    )(z1r, z2r, w_shift, b_shift, w_scale, b_scale)

    z2_new = z2of.reshape(B, C2, H, W)     # free reshape back to NCHW
    log_det = ld[:, 0, 0]                  # all 128 lanes hold the same sum
    return [z1, z2_new], log_det


def normalizing_flow_forward(z, flows, *, tile_hw=None):
    """Mirror of NormalizingFlow.forward: apply each flow in sequence,
    discarding per-flow log-dets.  `flows` is a list of (w, b) pairs."""
    # TODO(synk): inverse/sample/log_prob and the q0 base distribution
    # (torch.distributions) plus save/load are not forward-pass ops and have
    # no Pallas equivalent here; only forward() is implemented.
    x = z
    for (w, b) in flows:
        x, _ = affine_coupling_forward(x, w, b, tile_hw=tile_hw)
    return x


if __name__ == "__main__":
    key = jax.random.PRNGKey(0)
    ks = jax.random.split(key, 6)
    B, C1, C2, H, W = 2, 4, 4, 16, 16

    z1 = jax.random.normal(ks[0], (B, C1, H, W), jnp.float32)
    z2 = jax.random.normal(ks[1], (B, C2, H, W), jnp.float32)

    # Two coupling flows with deterministic synthetic 1x1-conv param_maps.
    flows = []
    for i in range(2):
        w = 0.1 * jax.random.normal(ks[2 + 2 * i], (2 * C2, C1), jnp.float32)
        b = 0.1 * jax.random.normal(ks[3 + 2 * i], (2 * C2,), jnp.float32)
        flows.append((w, b))

    # tile_hw=128 -> 2 token tiles per batch: exercises the log-det accumulator.
    (z1_out, z2_out), log_det0 = affine_coupling_forward([z1, z2], *flows[0],
                                                         tile_hw=128)
    x_out = normalizing_flow_forward([z1, z2], flows, tile_hw=128)
    jax.block_until_ready((z2_out, log_det0, x_out[0], x_out[1]))

    # Pure-JAX reference mirroring the torch NCHW semantics.
    def coupling_ref(z1_, z2_, w_, b_):
        param = jnp.einsum("oc,bchw->bohw", w_, z1_) + b_[None, :, None, None]
        shift = param[:, 0::2]
        scale = param[:, 1::2]
        return [z1_, z2_ * jnp.exp(scale) + shift], jnp.sum(scale, axis=(1, 2, 3))

    (z1_r, z2_r), ld_r = coupling_ref(z1, z2, *flows[0])
    xr = [z1, z2]
    for (w_, b_) in flows:
        xr, _ = coupling_ref(xr[0], xr[1], w_, b_)

    assert jnp.allclose(z1_out, z1)
    assert jnp.allclose(z2_out, z2_r, atol=1e-4, rtol=1e-4), "z2 mismatch"
    assert jnp.allclose(log_det0, ld_r, atol=1e-3, rtol=1e-4), "log_det mismatch"
    assert jnp.allclose(x_out[0], xr[0], atol=1e-4, rtol=1e-4), "chain z1 mismatch"
    assert jnp.allclose(x_out[1], xr[1], atol=1e-4, rtol=1e-4), "chain z2 mismatch"
    print("KERNEL_OK")
</pallas_src>

<mosaic_0001>
module attributes {stable_mosaic.version = 11 : i64} {
  func.func @_affine_coupling_kernel(%arg0: i32, %arg1: i32, %arg2: memref<1x4x128xf32, #tpu.memory_space<vmem>>, %arg3: memref<1x4x128xf32, #tpu.memory_space<vmem>>, %arg4: memref<4x4xf32, #tpu.memory_space<vmem>>, %arg5: memref<4x1xf32, #tpu.memory_space<vmem>>, %arg6: memref<4x4xf32, #tpu.memory_space<vmem>>, %arg7: memref<4x1xf32, #tpu.memory_space<vmem>>, %arg8: memref<1x4x128xf32, #tpu.memory_space<vmem>>, %arg9: memref<1x1x128xf32, #tpu.memory_space<vmem>>) attributes {dimension_semantics = [#tpu.dimension_semantics<parallel>, #tpu.dimension_semantics<arbitrary>], iteration_bounds = array<i64: 2, 2>, scalar_prefetch = 0 : i64, scratch_operands = 0 : i64, tpu.core_type = #tpu.core_type<tc>, window_params = [{transform_indices = @transform_0, window_bounds = array<i64: 1, 4, 128>}, {transform_indices = @transform_1, window_bounds = array<i64: 1, 4, 128>}, {pipeline_mode = #tpu.pipeline_mode<synchronous>, transform_indices = @transform_2, window_bounds = array<i64: 4, 4>}, {pipeline_mode = #tpu.pipeline_mode<synchronous>, transform_indices = @transform_3, window_bounds = array<i64: 4, 1>}, {pipeline_mode = #tpu.pipeline_mode<synchronous>, transform_indices = @transform_4, window_bounds = array<i64: 4, 4>}, {pipeline_mode = #tpu.pipeline_mode<synchronous>, transform_indices = @transform_5, window_bounds = array<i64: 4, 1>}, {transform_indices = @transform_6, window_bounds = array<i64: 1, 4, 128>}, {transform_indices = @transform_7, window_bounds = array<i64: 1, 1, 128>}]} {
    %c0 = arith.constant 0 : index
    %c0_0 = arith.constant 0 : index
    %c0_1 = arith.constant 0 : index
    %0 = vector.load %arg2[%c0, %c0_0, %c0_1] : memref<1x4x128xf32, #tpu.memory_space<vmem>>, vector<1x4x128xf32>
    %1 = vector.shape_cast %0 : vector<1x4x128xf32> to vector<4x128xf32>
    %c0_2 = arith.constant 0 : index
    %c0_3 = arith.constant 0 : index
    %2 = vector.load %arg4[%c0_2, %c0_3] : memref<4x4xf32, #tpu.memory_space<vmem>>, vector<4x4xf32>
    %cst = arith.constant dense<0.000000e+00> : vector<4x128xf32>
    %3 = tpu.matmul %2, %1, %cst {dimension_numbers = #tpu.dot_dimension_numbers<[1], [0], [0], [1], [0, 0, 1, 1], [], []>} : vector<4x4xf32>, vector<4x128xf32>, vector<4x128xf32> -> vector<4x128xf32>
    %c0_4 = arith.constant 0 : index
    %c0_5 = arith.constant 0 : index
    %4 = vector.load %arg5[%c0_4, %c0_5] : memref<4x1xf32, #tpu.memory_space<vmem>>, vector<4x1xf32>
    %5 = vector.broadcast %4 : vector<4x1xf32> to vector<4x128xf32>
    %6 = arith.addf %3, %5 : vector<4x128xf32>
    %c0_6 = arith.constant 0 : index
    %c0_7 = arith.constant 0 : index
    %7 = vector.load %arg6[%c0_6, %c0_7] : memref<4x4xf32, #tpu.memory_space<vmem>>, vector<4x4xf32>
    %cst_8 = arith.constant dense<0.000000e+00> : vector<4x128xf32>
    %8 = tpu.matmul %7, %1, %cst_8 {dimension_numbers = #tpu.dot_dimension_numbers<[1], [0], [0], [1], [0, 0, 1, 1], [], []>} : vector<4x4xf32>, vector<4x128xf32>, vector<4x128xf32> -> vector<4x128xf32>
    %c0_9 = arith.constant 0 : index
    %c0_10 = arith.constant 0 : index
    %9 = vector.load %arg7[%c0_9, %c0_10] : memref<4x1xf32, #tpu.memory_space<vmem>>, vector<4x1xf32>
    %10 = vector.broadcast %9 : vector<4x1xf32> to vector<4x128xf32>
    %11 = arith.addf %8, %10 : vector<4x128xf32>
    %c0_11 = arith.constant 0 : index
    %c0_12 = arith.constant 0 : index
    %c0_13 = arith.constant 0 : index
    %12 = vector.load %arg3[%c0_11, %c0_12, %c0_13] : memref<1x4x128xf32, #tpu.memory_space<vmem>>, vector<1x4x128xf32>
    %13 = vector.shape_cast %12 : vector<1x4x128xf32> to vector<4x128xf32>
    %14 = math.exp %11 : vector<4x128xf32>
    %15 = arith.mulf %13, %14 : vector<4x128xf32>
    %16 = arith.addf %15, %6 : vector<4x128xf32>
    %c0_14 = arith.constant 0 : index
    %c0_15 = arith.constant 0 : index
    %c0_16 = arith.constant 0 : index
    %17 = vector.load %arg8[%c0_14, %c0_15, %c0_16] : memref<1x4x128xf32, #tpu.memory_space<vmem>>, vector<1x4x128xf32>
    %18 = vector.shape_cast %17 : vector<1x4x128xf32> to vector<4x128xf32>
    %19 = vector.shape_cast %16 : vector<4x128xf32> to vector<1x4x128xf32>
    tpu.vector_store %arg8[%c0_14, %c0_15, %c0_16], %19 {strides = array<i32>} : memref<1x4x128xf32, #tpu.memory_space<vmem>>, vector<1x4x128xf32>,
    %c0_i32 = arith.constant 0 : i32
    %20 = arith.cmpi eq, %arg1, %c0_i32 : i32
    %21 = arith.extui %20 : i1 to i32
    %c0_i32_17 = arith.constant 0 : i32
    %22 = arith.cmpi ne, %21, %c0_i32_17 : i32
    scf.if %22 {
      %cst_25 = arith.constant 0.000000e+00 : f32
      %31 = vector.broadcast %cst_25 : f32 to vector<1x1x128xf32>
      %c0_26 = arith.constant 0 : index
      %c0_27 = arith.constant 0 : index
      %c0_28 = arith.constant 0 : index
      %32 = vector.load %arg9[%c0_26, %c0_27, %c0_28] : memref<1x1x128xf32, #tpu.memory_space<vmem>>, vector<1x1x128xf32>
      tpu.vector_store %arg9[%c0_26, %c0_27, %c0_28], %31 {strides = array<i32>} : memref<1x1x128xf32, #tpu.memory_space<vmem>>, vector<1x1x128xf32>,
    } else {
    }
    %c0_18 = arith.constant 0 : index
    %c0_19 = arith.constant 0 : index
    %c0_20 = arith.constant 0 : index
    %23 = vector.load %arg9[%c0_18, %c0_19, %c0_20] : memref<1x1x128xf32, #tpu.memory_space<vmem>>, vector<1x1x128xf32>
    %24 = vector.shape_cast %11 : vector<4x128xf32> to vector<1x4x128xf32>
    %cst_21 = arith.constant dense<0.000000e+00> : vector<1xf32>
    %25 = vector.multi_reduction <add>, %24, %cst_21 [1, 2] : vector<1x4x128xf32> to vector<1xf32>
    %26 = vector.shape_cast %25 : vector<1xf32> to vector<1x1x1xf32>
    %27 = vector.extract %26[0, 0, 0] : f32 from vector<1x1x1xf32>
    %28 = vector.broadcast %27 : f32 to vector<1x1x128xf32>
    %29 = arith.addf %23, %28 : vector<1x1x128xf32>
    %c0_22 = arith.constant 0 : index
    %c0_23 = arith.constant 0 : index
    %c0_24 = arith.constant 0 : index
    %30 = vector.load %arg9[%c0_22, %c0_23, %c0_24] : memref<1x1x128xf32, #tpu.memory_space<vmem>>, vector<1x1x128xf32>
    tpu.vector_store %arg9[%c0_22, %c0_23, %c0_24], %29 {strides = array<i32>} : memref<1x1x128xf32, #tpu.memory_space<vmem>>, vector<1x1x128xf32>,
    return
  }
  func.func @transform_0(%arg0: i32, %arg1: i32) -> (i32, i32, i32) {
    %c0_i32 = arith.constant 0 : i32
    %c0_i32_0 = arith.constant 0 : i32
    return %arg0, %c0_i32, %arg1 : i32, i32, i32
  }
  func.func @transform_1(%arg0: i32, %arg1: i32) -> (i32, i32, i32) {
    %c0_i32 = arith.constant 0 : i32
    %c0_i32_0 = arith.constant 0 : i32
    return %arg0, %c0_i32, %arg1 : i32, i32, i32
  }
  func.func @transform_2(%arg0: i32, %arg1: i32) -> (i32, i32) {
    %c0_i32 = arith.constant 0 : i32
    %c0_i32_0 = arith.constant 0 : i32
    %c0_i32_1 = arith.constant 0 : i32
    return %c0_i32, %c0_i32_0 : i32, i32
  }
  func.func @transform_3(%arg0: i32, %arg1: i32) -> (i32, i32) {
    %c0_i32 = arith.constant 0 : i32
    %c0_i32_0 = arith.constant 0 : i32
    %c0_i32_1 = arith.constant 0 : i32
    return %c0_i32, %c0_i32_0 : i32, i32
  }
  func.func @transform_4(%arg0: i32, %arg1: i32) -> (i32, i32) {
    %c0_i32 = arith.constant 0 : i32
    %c0_i32_0 = arith.constant 0 : i32
    %c0_i32_1 = arith.constant 0 : i32
    return %c0_i32, %c0_i32_0 : i32, i32
  }
  func.func @transform_5(%arg0: i32, %arg1: i32) -> (i32, i32) {
    %c0_i32 = arith.constant 0 : i32
    %c0_i32_0 = arith.constant 0 : i32
    %c0_i32_1 = arith.constant 0 : i32
    return %c0_i32, %c0_i32_0 : i32, i32
  }
  func.func @transform_6(%arg0: i32, %arg1: i32) -> (i32, i32, i32) {
    %c0_i32 = arith.constant 0 : i32
    %c0_i32_0 = arith.constant 0 : i32
    return %arg0, %c0_i32, %arg1 : i32, i32, i32
  }
  func.func @transform_7(%arg0: i32, %arg1: i32) -> (i32, i32, i32) {
    %c0_i32 = arith.constant 0 : i32
    %c0_i32_0 = arith.constant 0 : i32
    %c0_i32_1 = arith.constant 0 : i32
    return %arg0, %c0_i32, %c0_i32_0 : i32, i32, i32
  }
}

</mosaic_0001>

<bundles_post_ra>
// kernel: tpu_custom_call.1
= control target key start
LH: loop header
LB: loop body
LE: loop exit
PB: predicated region body
PF: predicated region fallthrough
CT: control target
= control target key end

     0   :  { %s1224_s0 = inlined_call_operand.vmem [shape: f32[2,4,256], index: 0, kind: input, shape index: {}]   ;;  %s1225_s1 = inlined_call_operand.hbm [shape: f32[2,4,256], index: 1, kind: input, shape index: {}, may-alias: {1,6}]   ;;  %s1226_s2 = inlined_call_operand.vmem [shape: f32[4,4], index: 2, kind: input, shape index: {}]   ;;  %s1227_s3 = inlined_call_operand.vmem [shape: f32[4,1], index: 3, kind: input, shape index: {}]   ;;  %s1228_s4 = inlined_call_operand.vmem [shape: f32[4,4], index: 4, kind: input, shape index: {}]   ;;  %s1229_s5 = inlined_call_operand.vmem [shape: f32[4,1], index: 5, kind: input, shape index: {}]   ;;  %s1230_s6 = inlined_call_operand.hbm [shape: f32[2,4,256], index: 6, kind: output, shape index: {0}, may-alias: {1,6}]   ;;  %s1231_s7 = inlined_call_operand.hbm [shape: f32[2,1,128], index: 7, kind: output, shape index: {1}]  }
   0x1   :  { %1243 = sst [smem:[#allocation21_spill]] %s1225_s1 }
   0x2   :  { %1244 = sst [smem:[#allocation22_spill]] %s1231_s7 }
   0x3   :  { %13 = vsyncpa [#allocation3], 0 }
   0x4   :  { %15 = vsyncpa [#allocation3 + $0x1], 0 }
   0x5   :  { %16 = vsyncpa [#allocation4], 0 }
   0x6   :  { %18 = vsyncpa [#allocation4 + $0x1], 0 }
   0x7   :  { %19 = vsyncpa [#allocation7], 0 }
   0x8   :  { %21 = vsyncpa [#allocation7 + $0x1], 0  ;;  %s976_s24 = smov 0   ;;  %s978_s25 = smov 0  }
   0x9   :  { %s980_s26 = smov 0   ;;  %s982_s27 = smov 0  }
   0xa   :  { %s984_s28 = smov 0   ;;  %s986_s29 = smov 0  }
   0xb   :  { %s988_s30 = smov 0   ;;  %s990_s8 = smov 0  }
   0xc   :  { %s992_s9 = smov 0   ;;  %s994_s10 = smov 0  }
   0xd   :  { %s996_s11 = smov 0  }
   0xe LB: > { %1245 = sst [smem:[#allocation11_spill]] %s892_s24  ;;  %s612_s12 = sadd.s32 4294967295, %s932_s11   ;;  %s932_s11 = sphi %s996_s11, %s27_s11   ;;  %s928_s10 = sphi %s994_s10, %s1276_s10   ;;  %s924_s9 = sphi %s992_s9, %s1283_s9   ;;  %s920_s8 = sphi %s990_s8, %s1274_s8   ;;  %s916_s30 = sphi %s988_s30, %s1282_s30   ;;  %s912_s29 = sphi %s986_s29, %s1281_s29   ;;  %s908_s28 = sphi %s984_s28, %s1280_s28   ;;  %s904_s27 = sphi %s982_s27, %s1279_s27   ;;  %s900_s26 = sphi %s980_s26, %s1272_s26   ;;  %s896_s25 = sphi %s978_s25, %s1278_s25   ;;  %s892_s24 = sphi %s976_s24, %s1277_s24  }
   0xf   : > { %1246 = sst [smem:[#allocation12_spill]] %s900_s26  ;;  %s613_s13 = sadd.s32 4294967294, %s932_s11  }
  0x10   : > { %1247 = sst [smem:[#allocation13_spill]] %s904_s27  ;;  %s36_s14 = sadd.s32 1, %s924_s9 }
  0x11   : > { %1248 = sst [smem:[#allocation14_spill]] %s928_s10  ;;  %s39_s15 = sadd.s32 1, %s928_s10 }
  0x12   : > { %p37_p0 = scmp.ge.s32.totalorder %s36_s14, 2  ;;  %s76_s16 = sadd.s32 1, %s912_s29 }
  0x13   : > { %p83_p1 = scmp.ne.s32.totalorder %s912_s29, %s908_s28  ;;  %p84_p2 = scmp.eq.s32.totalorder %s932_s11, 0 }
  0x14   : > { %s1285_s14 = smov (%p37_p0, %s36_s14), 0  ;;  %s1287_s15 = smov (!%p37_p0, %s39_s15), %s928_s10 }
  0x15   : > { %1249 = sst [smem:[#allocation15_spill]] %s1285_s14  ;;  %s72_s17 = ssub.s32 %s924_s9, %s1285_s14 }
  0x16   : > { %p1044_p3 = por %p84_p2, %p83_p1  ;;  %p41_p4 = scmp.ge.s32.totalorder %s1287_s15, 2 }
  0x17   : > { %p89_p5 = scmp.ne.s32.totalorder %s908_s28, %s904_s27  ;;  %p90_p6 = scmp.eq.s32.totalorder %s612_s12, 0 }
  0x18   : > { %p1050_p7 = scmp.eq.s32.totalorder %s612_s12, 3  ;;  %s1289_s15 = smov (%p41_p4, %s1287_s15), 0 }
  0x19   : > { %1252 = sst [smem:[#allocation16_spill]] %s1289_s15  ;;  %p1056_p8 = por %p90_p6, %p89_p5 }
  0x1a   : > { %p1062_p9 = por %p1050_p7, %p83_p1  ;;  %s71_s22 = ssub.s32 %s928_s10, %s1289_s15 }
  0x1b   : > { %p205_p10 = scmp.eq.s32.totalorder %s613_s13, 3  ;;  %s73_s23 = sor.u32 %s72_s17, %s71_s22 }
  0x1c   : > { %p212_p11 = scmp.eq.s32.totalorder %s71_s22, 0  ;;  %p74_p12 = scmp.eq.s32.totalorder %s73_s23, 0 }
  0x1d   : > { %p1068_p13 = por %p205_p10, %p89_p5  ;;  %s214_s14 = sadd.s32 1, %s900_s26 }
  0x1e   : > { %p224_p0 = scmp.ne.s32.totalorder %s900_s26, %s896_s25  ;;  %p230_p2 = scmp.ne.s32.totalorder %s896_s25, %s892_s24 }
  0x1f   : > { %s1255_s12 = scalar_select %p1068_p13, 1, 0 }
  0x20   : > { %s1076_s27 = scalar_select %p74_p12, %s912_s29, %s76_s16  }
  0x21   : > { %1256 = sst [smem:[#allocation17_spill]] %s1255_s12  ;;  %p1083_p1 = por %p224_p0, %p1050_p7 }
  0x22   : > { %1257 = sst [smem:[#allocation18_spill]] %s1076_s27  ;;  %p653_p4 = scmp.lt.s32.totalorder %s932_s11, 4 }
  0x23   : > { %s1079_s7 = scalar_select %p212_p11, %s900_s26, %s214_s14  }
  0x24   : > { %s1259_s15 = scalar_select %p1083_p1, 1, 0 }
  0x25   : > { %1258 = sst [smem:[#allocation19_spill]] %s1079_s7  ;;  %p1090_p6 = por %p230_p2, %p205_p10 }
  0x26   : > { %1260 = sst [smem:[#allocation20_spill]] %s1259_s15  ;;  %s274_s17 = sand.u32 1, %s912_s29  }
  0x27   : > { %s616_s22 = sshll.u32 %s274_s17, 2  ;;  %s617_s23 = sshll.u32 %s928_s10, 1 }
  0x28   : > { %s282_s16 = sadd.s32 %s924_s9, %s617_s23  ;;  %s278_s27 = scalar_lea.vmem [#allocation2], %s616_s22 }
  0x29   : > { %s288_s14 = sshll.u32 %s278_s27, 4  ;;  %s618_s7 = sshll.u32 %s282_s16, 2  ;;  %s289_s14 = int_to_ptr.vmem [resolvable:$true] %s288_s14 }
  0x2a   : > { %s1262_s1 = sld [smem:[#allocation21_spill]]  ;;  %p643_p5 = pnand %p653_p4, %p1044_p3 }
  0x2b   : > { %p619_p7 = scmp.ge.s32.totalorder %s932_s11, 1  ;;  %s275_s15 = scalar_lea.sflag [#allocation3], %s274_s17 }
  0x2c   : > { %p293_p10 = scmp.lt.s32.totalorder %s932_s11, 5 }
  0x2e   : > { %p294_p11 = pnand %p619_p7, %p293_p10 }
  0x2f   : > { %s1105_s22 = sand.u32 (!%p294_p11), 1, %s908_s28  }
  0x30   : > { %s284_s12 = scalar_lea.hbm %s1262_s1, %s618_s7  ;;  %297 = sbr.rel (%p294_p11) target bundleno = 393 (0x189), region = 44 }
  0x31   : > { %s286_s24 = sshll.u32 %s284_s12, 4  ;;  %s1241_s27 = sshll.u32 (!%p294_p11), %s1105_s22, 2  ;;  %s287_s24 = int_to_ptr.hbm [resolvable:$true] %s286_s24 }
  0x32   : > { %645 = dma.hbm_to_vmem [thread:$0]  (!%p643_p5), %s287_s24, 64, %s289_s14, %s275_s15  }
  0x33   : > { %s300_s26 = scalar_lea.sflag (!%p294_p11), [#allocation3], %s1105_s22  ;;  %s1111_s7 = scalar_lea.vmem (!%p294_p11), [#allocation2], %s1241_s27 }
  0x35   : > { %879 = dma.done.wait (%p1056_p8), %s300_s26, 64  }
  0x36   : > { %881 = vsyncadd (%p1056_p8), %s300_s26, 4294967232  ;;  %p347_p3 = scmp.lt.s32.totalorder %s920_s8, 1  ;;  %p349_p12 = scmp.lt.s32.totalorder %s916_s30, 1  ;;  %v934_v0 = vmov 0   ;;  %vm367_vm0 = vcmask 1043456   ;;  %vm363_vm1 = vcmask 31744  }
  0x37   : > { %745 = vset.pattern.permute.xlu0 %v934_v0  ;;  %v356_v1 = vld [vmem:[%s1226_s2] sm:$0xf]  ;;  %s1263_s1 = sshll.u32 %s1105_s22, 2  ;;  %s1264_s27 = sand.u32 1, %s896_s25  }
  0x38   : > { %s348_s15 = scalar_select %p347_p3, %s920_s8, 1  ;;  %v391_v2 = vld [vmem:[%s1228_s4] sm:$0xf] }
  0x39   : > { %s350_s18 = scalar_select %p349_p12, %s916_s30, 1  ;;  %v392_v3 = vld [vmem:[%s1229_s5] sm:$0xf] }
  0x3a   : > { %s622_s12 = sshll.u32 %s348_s15, 1  ;;  %395 = vperm.xlu0 %745, %v392_v3   ;;  %v357_v5 = vld [vmem:[%s1227_s3] sm:$0xf]  ;;  %s340_s10 = scalar_lea.vmem [#allocation5], %s1263_s1 }
  0x3b   : > { %s352_s17 = sadd.s32 %s622_s12, %s350_s18  ;;  %v421_v12 = vld [vmem:[%s1111_s7] sm:$0xf]  ;;  %s1144_s24 = scalar_lea.vmem [#allocation6], %s1264_s27 }
  0x3c   : > { %s623_s23 = sshll.u32 %s352_s17, 2  ;;  %p628_p8 = scmp.ne.s32.totalorder %s916_s30, 0 }
  0x3d   : > { %s354_s14 = scalar_lea.vmem %s1224_s0, %s623_s23 }
  0x3e   : > { %v355_v4 = vld [vmem:[%s354_s14] sm:$0xf] }
  0x3f   : > { %624 = vmatpush.msk.msra.mxu0 %vm367_vm0, %v355_v4  ;;  %626 = vmatpush.msk.msra.mxu1 %vm367_vm0, %v355_v4 }
  0x40   : > { %625 = vmatmul.msk.f32.vlgmr.msra.gmra.mxu0 %vm363_vm1, %v356_v1  ;;  %627 = vmatmul.msk.f32.vlgmr.msra.gmra.mxu1 %vm363_vm1, %v391_v2 }
  0x42   : > { %360 = vperm.xlu0 %745, %v357_v5  }
  0xac   : > { %v396_v6 = vpop.permute.xlu0 %395 }
  0xb4   : > { %v361_v10 = vpop.permute.xlu0 %360 }
  0xbd   : > { %v418_v7 = vpop.f32.mrf.mxu1  ;;  %v388_v11 = vpop.f32.mrf.mxu0 }
  0xbe   : > { %v419_v8 = vadd.f32 %v418_v7, %v396_v6  ;;  %v389_v14 = vadd.f32 %v388_v11, %v361_v10 }
  0xc0   : > { %v422_v9 = vmul.f32 1.442695, %v419_v8 }
  0xc2   : > { %746 = vpow2.f32 %v422_v9 }
  0xc8   : > { %v747_v13 = vpop.eup %746 }
  0xc9   : > { %v424_v15 = vmul.f32 %v747_v13, %v421_v12  ;;  %430 = sbr.rel (%p628_p8) target bundleno = 208 (0xd0), region = 52 }
  0xcb   : > { %v425_v16 = vadd.f32 %v424_v15, %v389_v14 }
  0xcd   : > { %426 = vst [vmem:[%s340_s10] sm:$0xf] %v425_v16 }
  0xce   : > { %v935_v17 = vmov 0.0  }
  0xcf   : > { %431 = vst [vmem:[%s1144_s24] sm:$0x1] %v935_v17 }
  0xd0 PF: > { %v433_v18 = vsel %vm367_vm0, %v419_v8, 0.0  ;;  %s630_s7 = sshll.u32 %s920_s8, 1  ;;  %s465_s14 = sshll.u32 %s340_s10, 4  ;;  %s466_s14 = int_to_ptr.vmem [resolvable:$true] %s465_s14 }
  0xd1   : > { %434 = vadd.xlane.f32.xlu0 %v433_v18  ;;  %s461_s12 = sadd.s32 %s916_s30, %s630_s7  ;;  %s447_s26 = scalar_lea.sflag [#allocation4], %s1105_s22 }
  0xd2   : > { %s631_s17 = sshll.u32 %s461_s12, 2  ;;  %s798_s30 = scalar_lea.hbm %s1230_s6, 16 }
  0xd3   : > { %s463_s20 = scalar_lea.hbm %s1230_s6, %s631_s17 }
  0xd4   : > { %s467_s19 = sshll.u32 %s463_s20, 4  ;;  %s468_s19 = int_to_ptr.hbm [resolvable:$true] %s467_s19 }
  0xd5   : > { %s792_s15 = sshra.s32 %s468_s19, 4  ;;  %s793_s15 = int_to_ptr.hbm [resolvable:$true] %s792_s15 }
  0xd6   : > { %s794_s18 = scalar_lea.hbm %s793_s15, 4  ;;  %p799_p5 = scmp.lt.s32.totalorder %s793_s15, %s1230_s6 }
  0xd7   : > { %p795_p0 = scmp.ne.s32.totalorder %s793_s15, %s794_s18  ;;  %p800_p7 = scmp.lt.s32.totalorder %s798_s30, %s794_s18 }
  0xd9   : > { %p796_p2 = pnand %p795_p0, %p1062_p9  ;;  %p801_p10 = por %p800_p7, %p799_p5 }
  0xdb   : > { %p797_p4 = pneg %p796_p2 }
  0xdd   : > { %p802_p11 = pnand %p801_p10, %p797_p4 }
  0xdf   : > { %805 = shalt.err (!%p802_p11)
}
  0xe0   : > { %638 = dma.vmem_to_hbm [thread:$0]  (%p1062_p9), %s466_s14, 64, %s468_s19, %s447_s26   ;;  %v432_v26 = vld [vmem:[%s1144_s24] sm:$0x1] }
  0xe1   : > { %s1265_s17 = sld [smem:[#allocation22_spill]]  ;;  %s478_s21 = sshll.u32 %s1144_s24, 4  ;;  %s479_s21 = int_to_ptr.vmem [resolvable:$true] %s478_s21 }
  0xe2   : > { %s1267_s14 = sand.u32 1, %s896_s25  }
  0xe3   : > { %s452_s19 = scalar_lea.sflag [#allocation7], %s1267_s14 }
  0xe7   : > { %s476_s16 = scalar_lea.hbm %s1265_s17, %s920_s8  ;;  %s826_s27 = scalar_lea.hbm %s1265_s17, 2 }
  0xe8   : > { %s480_s20 = sshll.u32 %s476_s16, 4  ;;  %s481_s20 = int_to_ptr.hbm [resolvable:$true] %s480_s20 }
  0xe9   : > { %s820_s26 = sshra.s32 %s481_s20, 4  ;;  %s821_s26 = int_to_ptr.hbm [resolvable:$true] %s820_s26 }
  0xea   : > { %s822_s18 = scalar_lea.hbm %s821_s26, 1  ;;  %p827_p8 = scmp.lt.s32.totalorder %s821_s26, %s1265_s17 }
  0xeb   : > { %p823_p9 = scmp.ne.s32.totalorder %s821_s26, %s822_s18  ;;  %p828_p0 = scmp.lt.s32.totalorder %s826_s27, %s822_s18 }
  0xed   : > { %p824_p3 = pnand %p823_p9, %p1083_p1  ;;  %p829_p2 = por %p828_p0, %p827_p8 }
  0xef   : > { %p825_p12 = pneg %p824_p3 }
  0xf1   : > { %p830_p4 = pnand %p829_p2, %p825_p12 }
 0x144   : > { %v435_v19 = vpop.xlane.xlu0 %434 }
 0x145   : > { %v436_v20 = vrot.slane %v435_v19, 4 }
 0x147   : > { %v437_v21 = vadd.f32 %v436_v20, %v435_v19 }
 0x149   : > { %v438_v22 = vrot.slane %v437_v21, 2 }
 0x14b   : > { %v439_v23 = vadd.f32 %v438_v22, %v437_v21 }
 0x14d   : > { %v440_v24 = vrot.slane %v439_v23, 1 }
 0x14f   : > { %v441_v25 = vadd.f32 %v440_v24, %v439_v23 }
 0x151   : > { %634 = vpush %v441_v25 }
 0x182   : > { %s635_s15 = spop %634 }
 0x183   : > { %v443_v27 = vstv %s635_s15 }
 0x184   : > { %v444_v28 = vadd.f32 %v443_v27, %v432_v26 }
 0x186   : > { %445 = vst [vmem:[%s1144_s24] sm:$0x1] %v444_v28 }
 0x187   : > { %833 = shalt.err (!%p830_p4)
}
 0x188   : > { %639 = dma.vmem_to_hbm [thread:$0]  (%p1083_p1), %s479_s21, 16, %s481_s20, %s452_s19  }
 0x189 PF: > { %s1268_s24 = sld [smem:[#allocation13_spill]]  ;;  %p654_p5 = scmp.ge.s32.totalorder %s932_s11, 2 }
 0x18b   : > { %p647_p7 = pnand %p654_p5, %p1068_p13 }
 0x18d   : > { %p648_p10 = pneg %p647_p7 }
 0x18f   : > { %s492_s22 = sand.u32 1, %s1268_s24  }
 0x190   : > { %s493_s10 = scalar_lea.sflag [#allocation4], %s492_s22 }
 0x191   : > { %883 = dma.done.wait (%p648_p10), %s493_s10, 64  }
 0x192   : > { %885 = vsyncadd (%p648_p10), %s493_s10, 4294967232  ;;  %s1270_s16 = sld [smem:[#allocation11_spill]]  ;;  %p650_p11 = pnand %p654_p5, %p1090_p6 }
 0x194   : > { %p651_p9 = pneg %p650_p11 }
 0x198   : > { %s502_s15 = sand.u32 1, %s1270_s16  }
 0x199   : > { %s503_s23 = scalar_lea.sflag [#allocation7], %s502_s15 }
 0x19a   : > { %887 = dma.done.wait (%p651_p9), %s503_s23, 16  }
 0x19b   : > { %889 = vsyncadd (%p651_p9), %s503_s23, 4294967280  ;;  %s27_s11 = sadd.s32 1, %s932_s11   ;;  %s1271_s21 = sld [smem:[#allocation12_spill]] }
 0x19c   : > { %p24_p1 = scmp.ge.s32.totalorder %s27_s11, 6   ;;  %s1272_s26 = sld [smem:[#allocation19_spill]] }
 0x19d   : > { %s1273_s20 = sld [smem:[#allocation18_spill]]  ;;  %s1277_s24 = smov %s896_s25 }
 0x19e   : > { %s1274_s8 = sld [smem:[#allocation14_spill]]  ;;  %s1279_s27 = smov %s908_s28 }
 0x19f   : > { %s1275_s14 = sld [smem:[#allocation15_spill]]  ;;  %s1280_s28 = smov %s912_s29 }
 0x1a0   : > { %s1276_s10 = sld [smem:[#allocation16_spill]]  ;;  %s1282_s30 = smov %s924_s9 }
 0x1a1   : > { %s1278_s25 = smov %s1271_s21  ;;  %26 = sbr.rel (!%p24_p1) target bundleno = 14 (0xe), region = 113 }
 0x1a3   : > { %s1281_s29 = smov %s1273_s20 }
 0x1a5   : > { %s1283_s9 = smov %s1275_s14 }
 0x1a6   :  { %508 = vsyncpa [#allocation3], 1 }
 0x1a7   :  { %510 = vsyncpa [#allocation3 + $0x1], 1 }
 0x1a8   :  { %511 = vsyncpa [#allocation4], 1 }
 0x1a9   :  { %513 = vsyncpa [#allocation4 + $0x1], 1 }
 0x1aa   :  { %514 = vsyncpa [#allocation7], 1 }
 0x1ab   :  { %516 = vsyncpa [#allocation7 + $0x1], 1 }

</bundles_post_ra>
